<compile_context>
chip_gen: v7x
topology: tpu7x:2x2x1
jax: 0.10.0
libtpu: 0.0.40
codegen_flags: <defaults>
</compile_context>

<pallas_src>
import functools

import jax
import jax.numpy as jnp
from jax.experimental import pallas as pl
from jax.experimental.pallas import tpu as pltpu


def _focal_kernel(x_ref, t_ref, out_ref, acc_ref, *, gamma, alpha_consts,
                  hw_total, r_tile, needs_mask):
    """x_ref: (1, C, r_tile, 128) logits; t_ref: (1, 1, r_tile, 128) int32."""
    j = pl.program_id(1)
    last = pl.num_programs(1) - 1
    C = x_ref.shape[1]

    @pl.when(j == 0)
    def _init():
        acc_ref[...] = jnp.zeros_like(acc_ref)

    t = t_ref[0, 0]                                    # (r_tile, 128) int32

    def xc(c):
        return x_ref[0, c].astype(jnp.float32)         # (r_tile, 128) f32

    # log_softmax over the class axis (leading dim -> plain dense VALU slab ops)
    m = xc(0)
    for c in range(1, C):
        m = jnp.maximum(m, xc(c))

    se = None                                          # sum of exp(x - m)
    z_t = jnp.zeros_like(m)                            # (x - m) at target class
    at = jnp.zeros_like(m) if alpha_consts is not None else None
    for c in range(C):
        z = xc(c) - m
        e = jnp.exp(z)
        se = e if se is None else se + e
        hit = t == c                                   # select-based gather
        z_t = jnp.where(hit, z, z_t)
        if alpha_consts is not None:
            at = jnp.where(hit, jnp.float32(alpha_consts[c]), at)

    logpt = z_t - jnp.log(se)                          # (r_tile, 128)
    pt = jnp.exp(logpt)                                # pt BEFORE alpha scaling
    omp = 1.0 - pt

    # gamma is static: avoid exp/log on the EUP for small integer exponents.
    g = float(gamma)
    if g == 2.0:
        focal = omp * omp
    elif g == 1.0:
        focal = omp
    elif g == 0.0:
        focal = jnp.ones_like(omp)
    elif g.is_integer() and 0.0 < g <= 8.0:
        focal = omp
        for _ in range(int(g) - 1):
            focal = focal * omp
    else:
        focal = jnp.power(omp, jnp.float32(g))

    wlogpt = logpt if at is None else logpt * at
    val = focal * wlogpt                               # -1 folded into epilogue

    def tile_partial(v):
        # per-step vreg tree reduce: (r_tile,128) -> (1,128); the cross-lane
        # reduce to a scalar happens once per batch in the epilogue.
        return jnp.sum(v, axis=0, keepdims=True)

    if needs_mask:
        # ragged handling only on the LAST spatial tile; steady state is bare.
        @pl.when(j != last)
        def _steady():
            acc_ref[...] += tile_partial(val)

        @pl.when(j == last)
        def _ragged():
            r_io = jax.lax.broadcasted_iota(jnp.int32, val.shape, 0)
            l_io = jax.lax.broadcasted_iota(jnp.int32, val.shape, 1)
            idx = (j * r_tile + r_io) * 128 + l_io
            # select (NOT multiply) so Inf/NaN from garbage lanes is discarded
            acc_ref[...] += tile_partial(jnp.where(idx < hw_total, val, 0.0))
    else:
        acc_ref[...] += tile_partial(val)

    @pl.when(j == last)
    def _epilogue():
        out_ref[...] = (-jnp.sum(acc_ref[...])).reshape(1, 1, 1)


def focal_loss(logits, target, *, gamma=2.0, alpha=(1.0, 1.0, 1.0, 1.0, 1.0),
               size_average=True, tile_positions=65536):
    """logits: (N, C, *spatial) float (f32 or bf16); target: (N, *spatial) ints."""
    N, C = int(logits.shape[0]), int(logits.shape[1])
    HW = 1
    for d in logits.shape[2:]:
        HW *= int(d)

    # ---- alpha handling (mirrors the PyTorch __init__), statically baked ----
    if alpha is None:
        alpha_list = None
    elif isinstance(alpha, (float, int)):
        alpha_list = [float(alpha), 1.0 - float(alpha)]
    else:
        alpha_list = [float(a) for a in alpha]         # static list/tuple/np
    if alpha_list is not None:
        assert len(alpha_list) >= C, "len(alpha) must cover all target classes"
        alpha_list = alpha_list[:C]
        if all(a == 1.0 for a in alpha_list):
            alpha_list = None          # multiplying by 1 is a no-op: specialize
    alpha_consts = tuple(alpha_list) if alpha_list is not None else None

    # ---- layout: native NCHW; spatial axis split into (rows, 128) lanes ----
    HW_pad = ((HW + 127) // 128) * 128
    x = logits.reshape(N, C, HW)
    t = target.reshape(N, 1, HW).astype(jnp.int32)
    if HW_pad != HW:
        # TODO(synk): ragged spatial sizes need a one-time pad (extra HBM pass);
        # typical H*W is a multiple of 128 and takes the zero-copy view path.
        x = jnp.pad(x, ((0, 0), (0, 0), (0, HW_pad - HW)))
        t = jnp.pad(t, ((0, 0), (0, 0), (0, HW_pad - HW)))
    R = HW_pad // 128
    x = x.reshape(N, C, R, 128)
    t = t.reshape(N, 1, R, 128)

    # wide spatial tiles; r_tile is a multiple of 8 or the full row count
    r_want = max(8, (int(tile_positions) // 128) // 8 * 8)
    r_tile = R if R <= r_want else r_want
    n_tiles = pl.cdiv(R, r_tile)
    needs_mask = (n_tiles * r_tile * 128) != HW

    kernel = functools.partial(_focal_kernel, gamma=float(gamma),
                               alpha_consts=alpha_consts, hw_total=HW,
                               r_tile=r_tile, needs_mask=needs_mask)

    partials = pl.pallas_call(
        kernel,
        out_shape=jax.ShapeDtypeStruct((N, 1, 1), jnp.float32),
        grid_spec=pltpu.PrefetchScalarGridSpec(
            num_scalar_prefetch=0,
            grid=(N, n_tiles),
            in_specs=[
                pl.BlockSpec((1, C, r_tile, 128), lambda b, j: (b, 0, j, 0)),
                pl.BlockSpec((1, 1, r_tile, 128), lambda b, j: (b, 0, j, 0)),
            ],
            out_specs=pl.BlockSpec((1, 1, 1), lambda b, j: (b, 0, 0)),
            scratch_shapes=[pltpu.VMEM((1, 128), jnp.float32)],
        ),
        compiler_params=pltpu.CompilerParams(
            dimension_semantics=("parallel", "arbitrary"),
            vmem_limit_bytes=32 * 1024 * 1024),
    )(x, t)

    total = jnp.sum(partials)
    if size_average:
        return total / jnp.float32(N * HW)
    return total


def _focal_loss_ref(logits, target, gamma=2.0, alpha=None, size_average=True):
    """Pure-JAX reference mirroring the PyTorch forward, for sanity checking."""
    N, C = logits.shape[0], logits.shape[1]
    x = jnp.transpose(logits.reshape(N, C, -1), (0, 2, 1)).reshape(-1, C)
    t = target.reshape(-1).astype(jnp.int32)
    logp = jax.nn.log_softmax(x.astype(jnp.float32), axis=1)
    logpt = jnp.take_along_axis(logp, t[:, None], axis=1)[:, 0]
    pt = jnp.exp(logpt)
    if alpha is not None:
        if isinstance(alpha, (float, int)):
            alpha = [float(alpha), 1.0 - float(alpha)]
        at = jnp.asarray(alpha, jnp.float32)[t]
        logpt = logpt * at
    loss = -1.0 * (1.0 - pt) ** gamma * logpt
    return loss.mean() if size_average else loss.sum()


if __name__ == "__main__":
    key = jax.random.PRNGKey(0)
    k1, k2, k3, k4 = jax.random.split(key, 4)

    # 1) 5 classes (module default width), non-trivial alpha, mean + sum
    N, C, H, W = 2, 5, 16, 16
    logits = jax.random.normal(k1, (N, C, H, W), jnp.float32)
    target = jax.random.randint(k2, (N, H, W), 0, C, jnp.int32)
    alpha = [0.5, 1.0, 1.5, 2.0, 0.75]

    out = jax.block_until_ready(
        focal_loss(logits, target, gamma=2.0, alpha=alpha, size_average=True))
    ref = _focal_loss_ref(logits, target, gamma=2.0, alpha=alpha,
                          size_average=True)
    assert jnp.allclose(out, ref, rtol=1e-4, atol=1e-5), (out, ref)

    out_s = jax.block_until_ready(
        focal_loss(logits, target, gamma=2.0, alpha=alpha, size_average=False))
    ref_s = _focal_loss_ref(logits, target, gamma=2.0, alpha=alpha,
                            size_average=False)
    assert jnp.allclose(out_s, ref_s, rtol=1e-4, atol=1e-4), (out_s, ref_s)

    # 2) default all-ones alpha (specialized away), multi-tile + ragged grid tile
    N2, C2, H2, W2 = 2, 4, 48, 48
    logits2 = jax.random.normal(k3, (N2, C2, H2, W2), jnp.float32)
    target2 = jax.random.randint(k4, (N2, H2, W2), 0, C2, jnp.int32)
    out2 = jax.block_until_ready(
        focal_loss(logits2, target2, gamma=2.0, alpha=[1.0] * C2,
                   size_average=True, tile_positions=1024))
    ref2 = _focal_loss_ref(logits2, target2, gamma=2.0, alpha=[1.0] * C2,
                           size_average=True)
    assert jnp.allclose(out2, ref2, rtol=1e-4, atol=1e-5), (out2, ref2)

    # 3) spatial size not a multiple of 128 (wrapper pad + in-kernel mask), no alpha
    logits3 = jax.random.normal(k1, (1, 3, 10, 10), jnp.float32)
    target3 = jax.random.randint(k2, (1, 10, 10), 0, 3, jnp.int32)
    out3 = jax.block_until_ready(
        focal_loss(logits3, target3, gamma=2.0, alpha=None, size_average=True))
    ref3 = _focal_loss_ref(logits3, target3, gamma=2.0, alpha=None,
                           size_average=True)
    assert jnp.allclose(out3, ref3, rtol=1e-4, atol=1e-5), (out3, ref3)

    print("KERNEL_OK")
</pallas_src>

<mosaic_0001>
module attributes {stable_mosaic.version = 11 : i64} {
  func.func @_focal_kernel(%arg0: i32, %arg1: i32, %arg2: memref<1x5x2x128xf32, #tpu.memory_space<vmem>>, %arg3: memref<1x1x2x128xi32, #tpu.memory_space<vmem>>, %arg4: memref<1x1x1xf32, #tpu.memory_space<vmem>>, %arg5: memref<1x128xf32, #tpu.memory_space<vmem>>) attributes {dimension_semantics = [#tpu.dimension_semantics<parallel>, #tpu.dimension_semantics<arbitrary>], iteration_bounds = array<i64: 2, 1>, scalar_prefetch = 0 : i64, scratch_operands = 1 : i64, tpu.core_type = #tpu.core_type<tc>, window_params = [{transform_indices = @transform_0, window_bounds = array<i64: 1, 5, 2, 128>}, {transform_indices = @transform_1, window_bounds = array<i64: 1, 1, 2, 128>}, {transform_indices = @transform_2, window_bounds = array<i64: 1, 1, 1>}]} {
    %c0_i32 = arith.constant 0 : i32
    %0 = arith.cmpi eq, %arg1, %c0_i32 : i32
    %1 = arith.extui %0 : i1 to i32
    %c0_i32_0 = arith.constant 0 : i32
    %2 = arith.cmpi ne, %1, %c0_i32_0 : i32
    scf.if %2 {
      %cst_55 = arith.constant 0.000000e+00 : f32
      %86 = vector.broadcast %cst_55 : f32 to vector<1x128xf32>
      %c0_56 = arith.constant 0 : index
      %c0_57 = arith.constant 0 : index
      %87 = vector.load %arg5[%c0_56, %c0_57] : memref<1x128xf32, #tpu.memory_space<vmem>>, vector<1x128xf32>
      tpu.vector_store %arg5[%c0_56, %c0_57], %86 {strides = array<i32>} : memref<1x128xf32, #tpu.memory_space<vmem>>, vector<1x128xf32>,
    } else {
    }
    %c0 = arith.constant 0 : index
    %c0_1 = arith.constant 0 : index
    %c0_2 = arith.constant 0 : index
    %c0_3 = arith.constant 0 : index
    %3 = vector.load %arg3[%c0, %c0_1, %c0_2, %c0_3] : memref<1x1x2x128xi32, #tpu.memory_space<vmem>>, vector<1x1x2x128xi32>
    %4 = vector.shape_cast %3 : vector<1x1x2x128xi32> to vector<2x128xi32>
    %c0_4 = arith.constant 0 : index
    %c0_5 = arith.constant 0 : index
    %c0_6 = arith.constant 0 : index
    %c0_7 = arith.constant 0 : index
    %5 = vector.load %arg2[%c0_4, %c0_5, %c0_6, %c0_7] : memref<1x5x2x128xf32, #tpu.memory_space<vmem>>, vector<1x1x2x128xf32>
    %6 = vector.shape_cast %5 : vector<1x1x2x128xf32> to vector<2x128xf32>
    %c0_8 = arith.constant 0 : index
    %c1 = arith.constant 1 : index
    %c0_9 = arith.constant 0 : index
    %c0_10 = arith.constant 0 : index
    %7 = vector.load %arg2[%c0_8, %c1, %c0_9, %c0_10] : memref<1x5x2x128xf32, #tpu.memory_space<vmem>>, vector<1x1x2x128xf32>
    %8 = vector.shape_cast %7 : vector<1x1x2x128xf32> to vector<2x128xf32>
    %9 = arith.maximumf %6, %8 : vector<2x128xf32>
    %c0_11 = arith.constant 0 : index
    %c2 = arith.constant 2 : index
    %c0_12 = arith.constant 0 : index
    %c0_13 = arith.constant 0 : index
    %10 = vector.load %arg2[%c0_11, %c2, %c0_12, %c0_13] : memref<1x5x2x128xf32, #tpu.memory_space<vmem>>, vector<1x1x2x128xf32>
    %11 = vector.shape_cast %10 : vector<1x1x2x128xf32> to vector<2x128xf32>
    %12 = arith.maximumf %9, %11 : vector<2x128xf32>
    %c0_14 = arith.constant 0 : index
    %c3 = arith.constant 3 : index
    %c0_15 = arith.constant 0 : index
    %c0_16 = arith.constant 0 : index
    %13 = vector.load %arg2[%c0_14, %c3, %c0_15, %c0_16] : memref<1x5x2x128xf32, #tpu.memory_space<vmem>>, vector<1x1x2x128xf32>
    %14 = vector.shape_cast %13 : vector<1x1x2x128xf32> to vector<2x128xf32>
    %15 = arith.maximumf %12, %14 : vector<2x128xf32>
    %c0_17 = arith.constant 0 : index
    %c4 = arith.constant 4 : index
    %c0_18 = arith.constant 0 : index
    %c0_19 = arith.constant 0 : index
    %16 = vector.load %arg2[%c0_17, %c4, %c0_18, %c0_19] : memref<1x5x2x128xf32, #tpu.memory_space<vmem>>, vector<1x1x2x128xf32>
    %17 = vector.shape_cast %16 : vector<1x1x2x128xf32> to vector<2x128xf32>
    %18 = arith.maximumf %15, %17 : vector<2x128xf32>
    %cst = arith.constant 0.000000e+00 : f32
    %19 = vector.broadcast %cst : f32 to vector<2x128xf32>
    %cst_20 = arith.constant 0.000000e+00 : f32
    %20 = vector.broadcast %cst_20 : f32 to vector<2x128xf32>
    %c0_21 = arith.constant 0 : index
    %c0_22 = arith.constant 0 : index
    %c0_23 = arith.constant 0 : index
    %c0_24 = arith.constant 0 : index
    %21 = vector.load %arg2[%c0_21, %c0_22, %c0_23, %c0_24] : memref<1x5x2x128xf32, #tpu.memory_space<vmem>>, vector<1x1x2x128xf32>
    %22 = vector.shape_cast %21 : vector<1x1x2x128xf32> to vector<2x128xf32>
    %23 = arith.subf %22, %18 : vector<2x128xf32>
    %24 = math.exp %23 : vector<2x128xf32>
    %c0_i32_25 = arith.constant 0 : i32
    %25 = vector.broadcast %c0_i32_25 : i32 to vector<2x128xi32>
    %26 = arith.cmpi eq, %4, %25 : vector<2x128xi32>
    %27 = arith.select %26, %23, %19 : vector<2x128xi1>, vector<2x128xf32>
    %cst_26 = arith.constant 5.000000e-01 : f32
    %28 = vector.broadcast %cst_26 : f32 to vector<2x128xf32>
    %29 = arith.select %26, %28, %20 : vector<2x128xi1>, vector<2x128xf32>
    %c0_27 = arith.constant 0 : index
    %c1_28 = arith.constant 1 : index
    %c0_29 = arith.constant 0 : index
    %c0_30 = arith.constant 0 : index
    %30 = vector.load %arg2[%c0_27, %c1_28, %c0_29, %c0_30] : memref<1x5x2x128xf32, #tpu.memory_space<vmem>>, vector<1x1x2x128xf32>
    %31 = vector.shape_cast %30 : vector<1x1x2x128xf32> to vector<2x128xf32>
    %32 = arith.subf %31, %18 : vector<2x128xf32>
    %33 = math.exp %32 : vector<2x128xf32>
    %34 = arith.addf %24, %33 : vector<2x128xf32>
    %c1_i32 = arith.constant 1 : i32
    %35 = vector.broadcast %c1_i32 : i32 to vector<2x128xi32>
    %36 = arith.cmpi eq, %4, %35 : vector<2x128xi32>
    %37 = arith.select %36, %32, %27 : vector<2x128xi1>, vector<2x128xf32>
    %cst_31 = arith.constant 1.000000e+00 : f32
    %38 = vector.broadcast %cst_31 : f32 to vector<2x128xf32>
    %39 = arith.select %36, %38, %29 : vector<2x128xi1>, vector<2x128xf32>
    %c0_32 = arith.constant 0 : index
    %c2_33 = arith.constant 2 : index
    %c0_34 = arith.constant 0 : index
    %c0_35 = arith.constant 0 : index
    %40 = vector.load %arg2[%c0_32, %c2_33, %c0_34, %c0_35] : memref<1x5x2x128xf32, #tpu.memory_space<vmem>>, vector<1x1x2x128xf32>
    %41 = vector.shape_cast %40 : vector<1x1x2x128xf32> to vector<2x128xf32>
    %42 = arith.subf %41, %18 : vector<2x128xf32>
    %43 = math.exp %42 : vector<2x128xf32>
    %44 = arith.addf %34, %43 : vector<2x128xf32>
    %c2_i32 = arith.constant 2 : i32
    %45 = vector.broadcast %c2_i32 : i32 to vector<2x128xi32>
    %46 = arith.cmpi eq, %4, %45 : vector<2x128xi32>
    %47 = arith.select %46, %42, %37 : vector<2x128xi1>, vector<2x128xf32>
    %cst_36 = arith.constant 1.500000e+00 : f32
    %48 = vector.broadcast %cst_36 : f32 to vector<2x128xf32>
    %49 = arith.select %46, %48, %39 : vector<2x128xi1>, vector<2x128xf32>
    %c0_37 = arith.constant 0 : index
    %c3_38 = arith.constant 3 : index
    %c0_39 = arith.constant 0 : index
    %c0_40 = arith.constant 0 : index
    %50 = vector.load %arg2[%c0_37, %c3_38, %c0_39, %c0_40] : memref<1x5x2x128xf32, #tpu.memory_space<vmem>>, vector<1x1x2x128xf32>
    %51 = vector.shape_cast %50 : vector<1x1x2x128xf32> to vector<2x128xf32>
    %52 = arith.subf %51, %18 : vector<2x128xf32>
    %53 = math.exp %52 : vector<2x128xf32>
    %54 = arith.addf %44, %53 : vector<2x128xf32>
    %c3_i32 = arith.constant 3 : i32
    %55 = vector.broadcast %c3_i32 : i32 to vector<2x128xi32>
    %56 = arith.cmpi eq, %4, %55 : vector<2x128xi32>
    %57 = arith.select %56, %52, %47 : vector<2x128xi1>, vector<2x128xf32>
    %cst_41 = arith.constant 2.000000e+00 : f32
    %58 = vector.broadcast %cst_41 : f32 to vector<2x128xf32>
    %59 = arith.select %56, %58, %49 : vector<2x128xi1>, vector<2x128xf32>
    %c0_42 = arith.constant 0 : index
    %c4_43 = arith.constant 4 : index
    %c0_44 = arith.constant 0 : index
    %c0_45 = arith.constant 0 : index
    %60 = vector.load %arg2[%c0_42, %c4_43, %c0_44, %c0_45] : memref<1x5x2x128xf32, #tpu.memory_space<vmem>>, vector<1x1x2x128xf32>
    %61 = vector.shape_cast %60 : vector<1x1x2x128xf32> to vector<2x128xf32>
    %62 = arith.subf %61, %18 : vector<2x128xf32>
    %63 = math.exp %62 : vector<2x128xf32>
    %64 = arith.addf %54, %63 : vector<2x128xf32>
    %c4_i32 = arith.constant 4 : i32
    %65 = vector.broadcast %c4_i32 : i32 to vector<2x128xi32>
    %66 = arith.cmpi eq, %4, %65 : vector<2x128xi32>
    %67 = arith.select %66, %62, %57 : vector<2x128xi1>, vector<2x128xf32>
    %cst_46 = arith.constant 7.500000e-01 : f32
    %68 = vector.broadcast %cst_46 : f32 to vector<2x128xf32>
    %69 = arith.select %66, %68, %59 : vector<2x128xi1>, vector<2x128xf32>
    %70 = math.log %64 : vector<2x128xf32>
    %71 = arith.subf %67, %70 : vector<2x128xf32>
    %72 = math.exp %71 : vector<2x128xf32>
    %cst_47 = arith.constant 1.000000e+00 : f32
    %73 = vector.broadcast %cst_47 : f32 to vector<2x128xf32>
    %74 = arith.subf %73, %72 : vector<2x128xf32>
    %75 = arith.mulf %74, %74 : vector<2x128xf32>
    %76 = arith.mulf %71, %69 : vector<2x128xf32>
    %77 = arith.mulf %75, %76 : vector<2x128xf32>
    %c0_48 = arith.constant 0 : index
    %c0_49 = arith.constant 0 : index
    %78 = vector.load %arg5[%c0_48, %c0_49] : memref<1x128xf32, #tpu.memory_space<vmem>>, vector<1x128xf32>
    %cst_50 = arith.constant dense<0.000000e+00> : vector<128xf32>
    %79 = vector.multi_reduction <add>, %77, %cst_50 [0] : vector<2x128xf32> to vector<128xf32>
    %80 = vector.shape_cast %79 : vector<128xf32> to vector<1x128xf32>
    %81 = arith.addf %78, %80 : vector<1x128xf32>
    %c0_51 = arith.constant 0 : index
    %c0_52 = arith.constant 0 : index
    %82 = vector.load %arg5[%c0_51, %c0_52] : memref<1x128xf32, #tpu.memory_space<vmem>>, vector<1x128xf32>
    tpu.vector_store %arg5[%c0_51, %c0_52], %81 {strides = array<i32>} : memref<1x128xf32, #tpu.memory_space<vmem>>, vector<1x128xf32>,
    %c0_i32_53 = arith.constant 0 : i32
    %83 = arith.cmpi eq, %arg1, %c0_i32_53 : i32
    %84 = arith.extui %83 : i1 to i32
    %c0_i32_54 = arith.constant 0 : i32
    %85 = arith.cmpi ne, %84, %c0_i32_54 : i32
    scf.if %85 {
      %c0_55 = arith.constant 0 : index
      %c0_56 = arith.constant 0 : index
      %86 = vector.load %arg5[%c0_55, %c0_56] : memref<1x128xf32, #tpu.memory_space<vmem>>, vector<1x128xf32>
      %87 = vector.shape_cast %86 : vector<1x128xf32> to vector<1x1x128xf32>
      %cst_57 = arith.constant dense<0.000000e+00> : vector<1xf32>
      %88 = vector.multi_reduction <add>, %87, %cst_57 [1, 2] : vector<1x1x128xf32> to vector<1xf32>
      %89 = vector.shape_cast %88 : vector<1xf32> to vector<1x1x1xf32>
      %90 = vector.extract %89[0, 0, 0] : f32 from vector<1x1x1xf32>
      %cst_58 = arith.constant 0.000000e+00 : f32
      %91 = arith.subf %cst_58, %90 : f32
      %92 = vector.broadcast %91 : f32 to vector<1x1x1xf32>
      %c0_59 = arith.constant 0 : index
      %c0_60 = arith.constant 0 : index
      %c0_61 = arith.constant 0 : index
      %93 = vector.load %arg4[%c0_59, %c0_60, %c0_61] : memref<1x1x1xf32, #tpu.memory_space<vmem>>, vector<1x1x1xf32>
      tpu.vector_store %arg4[%c0_59, %c0_60, %c0_61], %92 {strides = array<i32>} : memref<1x1x1xf32, #tpu.memory_space<vmem>>, vector<1x1x1xf32>,
    } else {
    }
    return
  }
  func.func @transform_0(%arg0: i32, %arg1: i32) -> (i32, i32, i32, i32) {
    %c0_i32 = arith.constant 0 : i32
    %c0_i32_0 = arith.constant 0 : i32
    %c0_i32_1 = arith.constant 0 : i32
    return %arg0, %c0_i32, %arg1, %c0_i32_0 : i32, i32, i32, i32
  }
  func.func @transform_1(%arg0: i32, %arg1: i32) -> (i32, i32, i32, i32) {
    %c0_i32 = arith.constant 0 : i32
    %c0_i32_0 = arith.constant 0 : i32
    %c0_i32_1 = arith.constant 0 : i32
    return %arg0, %c0_i32, %arg1, %c0_i32_0 : i32, i32, i32, i32
  }
  func.func @transform_2(%arg0: i32, %arg1: i32) -> (i32, i32, i32) {
    %c0_i32 = arith.constant 0 : i32
    %c0_i32_0 = arith.constant 0 : i32
    %c0_i32_1 = arith.constant 0 : i32
    return %arg0, %c0_i32, %c0_i32_0 : i32, i32, i32
  }
}

</mosaic_0001>

<bundles_post_ra>
// kernel: tpu_custom_call.1
= control target key start
LH: loop header
LB: loop body
LE: loop exit
PB: predicated region body
PF: predicated region fallthrough
CT: control target
= control target key end

     0   :  { %7 = vsyncpa [#allocation4], 0  ;;  %s794_s0 = inlined_call_operand.hbm [shape: f32[2,5,2,128], index: 0, kind: input, shape index: {}]   ;;  %s795_s1 = inlined_call_operand.hbm [shape: s32[2,1,2,128], index: 1, kind: input, shape index: {}]   ;;  %s796_s2 = inlined_call_operand.vmem [shape: f32[2,1,1], index: 2, kind: output, shape index: {}]  }
   0x1   :  { %9 = vsyncpa [#allocation4 + $0x1], 0 }
   0x2   :  { %10 = vsyncpa [#allocation6], 0 }
   0x3   :  { %12 = vsyncpa [#allocation6 + $0x1], 0  ;;  %s633_s9 = smov 0   ;;  %s635_s10 = smov 0  }
   0x4   :  { %s637_s11 = smov 0   ;;  %s639_s12 = smov 0  }
   0x5   :  { %s641_s13 = smov 0   ;;  %s643_s14 = smov 0  }
   0x6 LB: > { %s400_s15 = sadd.s32 4294967295, %s611_s14   ;;  %s30_s16 = sadd.s32 1, %s607_s13  ;;  %s611_s14 = sphi %s643_s14, %s18_s14   ;;  %s607_s13 = sphi %s641_s13, %s807_s13   ;;  %s603_s12 = sphi %s639_s12, %s806_s12   ;;  %s599_s11 = sphi %s637_s11, %s805_s11   ;;  %s595_s10 = sphi %s635_s10, %s804_s10   ;;  %s591_s9 = sphi %s633_s9, %s803_s9  }
   0x7   : > { %p32_p0 = scmp.ge.s32.totalorder %s30_s16, 2  ;;  %s39_s17 = sadd.s32 1, %s599_s11 }
   0x8   : > { %p46_p1 = scmp.ne.s32.totalorder %s599_s11, %s595_s10  ;;  %p47_p2 = scmp.eq.s32.totalorder %s611_s14, 0 }
   0x9   : > { %s809_s16 = smov (%p32_p0, %s30_s16), 0  ;;  %p52_p4 = scmp.ne.s32.totalorder %s595_s10, %s591_s9 }
   0xa   : > { %p48_p3 = por %p47_p2, %p46_p1  ;;  %s34_s18 = ssub.s32 %s607_s13, %s809_s16 }
   0xb   : > { %p53_p5 = scmp.eq.s32.totalorder %s400_s15, 0  ;;  %p37_p6 = scmp.eq.s32.totalorder %s34_s18, 0 }
   0xc   : > { %p431_p8 = scmp.lt.s32.totalorder %s611_s14, 2  ;;  %s681_s21 = sand.u32 1, %s599_s11  }
   0xd   : > { %p672_p7 = por %p53_p5, %p52_p4  ;;  %s416_s22 = smul.u32 160, %s607_s13 }
   0xe   : > { %s678_s20 = scalar_select %p37_p6, %s599_s11, %s39_s17  }
   0xf   : > { %s798_s19 = scalar_select %p672_p7, 1, 0 }
  0x10   : > { %s415_s23 = smul.u32 10, %s681_s21  ;;  %s688_s26 = scalar_lea.hbm %s794_s0, %s416_s22 }
  0x11   : > { %p690_p9 = pnand %p431_p8, %p48_p3  ;;  %s131_s30 = scalar_lea.sflag [#allocation4], %s681_s21 }
  0x12   : > { %s134_s28 = scalar_lea.vmem [#allocation3], %s415_s23  ;;  %s497_s3 = scalar_lea.hbm %s688_s26, 160 }
  0x13   : > { %s142_s29 = sshll.u32 %s134_s28, 4  ;;  %p498_p10 = scmp.ne.s32.totalorder %s688_s26, %s497_s3  ;;  %s694_s29 = int_to_ptr.vmem [resolvable:$true] %s142_s29 }
  0x14   : > { %p499_p11 = pneg %p690_p9  ;;  %s502_s6 = scalar_lea.hbm %s794_s0, 320 }
  0x15   : > { %p503_p0 = scmp.lt.u32.totalorder %s688_s26, %s794_s0  ;;  %p504_p1 = scmp.lt.u32.totalorder %s502_s6, %s497_s3 }
  0x16   : > { %p500_p12 = pnand %p499_p11, %p498_p10  ;;  %p506_p3 = scmp.lt.u32.totalorder %s497_s3, %s688_s26 }
  0x17   : > { %p505_p2 = por %p504_p1, %p503_p0 }
  0x18   : > { %p501_p13 = pneg %p500_p12 }
  0x19   : > { %p507_p4 = por %p506_p3, %p505_p2 }
  0x1b   : > { %p508_p5 = pnand %p507_p4, %p501_p13 }
  0x1d   : > { %511 = shalt.err (!%p508_p5)
}
  0x1e   : > { %s512_s9 = scalar_lea.vmem %s694_s29, 160  ;;  %s613_s15 = smov [#allocation3]  }
  0x1f   : > { %p513_p6 = scmp.ne.s32.totalorder %s694_s29, %s512_s9  ;;  %s517_s17 = sshll.u32 %s613_s15, 4  ;;  %s518_s17 = int_to_ptr.vmem [resolvable:$false] %s517_s17 }
  0x20   : > { %s519_s18 = scalar_lea.vmem %s518_s17, 320  ;;  %p520_p12 = scmp.lt.s32.totalorder %s694_s29, %s518_s17 }
  0x21   : > { %p515_p8 = pnand %p513_p6, %p499_p11  ;;  %p521_p0 = scmp.lt.s32.totalorder %s519_s18, %s512_s9 }
  0x23   : > { %p516_p10 = pneg %p515_p8  ;;  %p522_p1 = por %p521_p0, %p520_p12 }
  0x25   : > { %p523_p2 = pnand %p522_p1, %p516_p10 }
  0x27   : > { %526 = shalt.err (!%p523_p2)
}
  0x28   : > { %s614_s22 = smov 32   ;;  %s615_s23 = smov 2  }
  0x29   : > { %427 = dma.hbm_to_vmem [thread:$0]  (!%p690_p9), %s688_s26, 160, %s694_s29, %s131_s30, %s614_s22, %s614_s22, %s615_s23  }
  0x2a   : > { %p407_p13 = scmp.ge.s32.totalorder %s611_s14, 1  ;;  %p169_p3 = scmp.lt.s32.totalorder %s611_s14, 3 }
  0x2b   : > { %s405_s24 = sshll.u32 %s681_s21, 1  ;;  %s406_s28 = sshll.u32 %s607_s13, 5 }
  0x2c   : > { %p727_p4 = pnand %p407_p13, %p169_p3  ;;  %s156_s3 = scalar_lea.vmem [#allocation5], %s405_s24 }
  0x2d   : > { %s164_s4 = sshll.u32 %s156_s3, 4  ;;  %s735_s7 = scalar_lea.hbm %s795_s1, %s406_s28  ;;  %s165_s4 = int_to_ptr.vmem [resolvable:$true] %s164_s4 }
  0x2e   : > { %s800_s25 = scalar_select %p727_p4, 1, 0 }
  0x2f   : > { %s153_s26 = scalar_lea.sflag [#allocation6], %s681_s21  ;;  %s527_s29 = scalar_lea.hbm %s735_s7, 32 }
  0x30   : > { %p528_p5 = scmp.ne.s32.totalorder %s735_s7, %s527_s29  ;;  %s532_s9 = scalar_lea.hbm %s795_s1, 64 }
  0x31   : > { %p533_p10 = scmp.lt.u32.totalorder %s735_s7, %s795_s1  ;;  %p534_p12 = scmp.lt.u32.totalorder %s532_s9, %s527_s29 }
  0x32   : > { %p530_p6 = pnand %p528_p5, %p499_p11  ;;  %p536_p1 = scmp.lt.u32.totalorder %s527_s29, %s735_s7 }
  0x33   : > { %p535_p0 = por %p534_p12, %p533_p10 }
  0x34   : > { %p531_p8 = pneg %p530_p6 }
  0x35   : > { %p537_p2 = por %p536_p1, %p535_p0 }
  0x37   : > { %p538_p13 = pnand %p537_p2, %p531_p8 }
  0x39   : > { %541 = shalt.err (!%p538_p13)
}
  0x3a   : > { %s542_s21 = scalar_lea.vmem %s165_s4, 32  ;;  %s616_s18 = smov [#allocation5]  }
  0x3b   : > { %p543_p3 = scmp.ne.s32.totalorder %s165_s4, %s542_s21  ;;  %s547_s22 = sshll.u32 %s616_s18, 4  ;;  %s548_s22 = int_to_ptr.vmem [resolvable:$false] %s547_s22 }
  0x3c   : > { %s549_s23 = scalar_lea.vmem %s548_s22, 64  ;;  %p550_p7 = scmp.lt.s32.totalorder %s165_s4, %s548_s22 }
  0x3d   : > { %p545_p5 = pnand %p543_p3, %p499_p11  ;;  %p551_p4 = scmp.lt.s32.totalorder %s549_s23, %s542_s21 }
  0x3f   : > { %p546_p6 = pneg %p545_p5  ;;  %p552_p10 = por %p551_p4, %p550_p7 }
  0x41   : > { %p553_p12 = pnand %p552_p10, %p546_p6 }
  0x43   : > { %556 = shalt.err (!%p553_p12)
}
  0x44   : > { %430 = dma.hbm_to_vmem [thread:$0]  (!%p690_p9), %s735_s7, 32, %s165_s4, %s153_s26  }
  0x45   : > { %p801_p8 = scmp.ne.s32.totalorder %s800_s25, 0 }
  0x46   : > { %s175_s24 = sand.u32 (!%p801_p8), 1, %s595_s10   ;;  %p802_p11 = scmp.ne.s32.totalorder (!%p801_p8), %s798_s19, 0 }
  0x47   : > { %173 = sbr.rel (%p801_p8) target bundleno = 381 (0x17d), region = 28  ;;  %s176_s3 = scalar_lea.sflag (!%p801_p8), [#allocation4], %s175_s24 }
  0x48   : > { %s417_s28 = smul.u32 (!%p801_p8), 10, %s175_s24 }
  0x4a   : > { %s179_s5 = scalar_lea.vmem (!%p801_p8), [#allocation3], %s417_s28 }
  0x4e   : > { %582 = dma.done.wait (%p802_p11), %s176_s3, 160  }
  0x4f   : > { %584 = vsyncadd (%p802_p11), %s176_s3, 4294967136  ;;  %s408_s6 = sshll.u32 %s175_s24, 1  ;;  %s185_s29 = scalar_lea.sflag [#allocation6], %s175_s24 }
  0x50   : > { %s764_s27 = scalar_lea.vmem [#allocation5], %s408_s6 }
  0x51   : > { %586 = dma.done.wait (%p802_p11), %s185_s29, 32  }
  0x52   : > { %588 = vsyncadd (%p802_p11), %s185_s29, 4294967264  ;;  %v617_v0 = vmov 0.0   ;;  %v221_v1 = vld [vmem:[%s179_s5] sm:$0x3]  ;;  %v409_v2 = vld [vmem:[%s179_s5 + $0x2] sm:$0x3] }
  0x53   : > { %219 = vst [vmem:[#allocation2] sm:$0x1] %v617_v0  ;;  %v224_v3 = vmax.f32 %v221_v1, %v409_v2  ;;  %v410_v4 = vld [vmem:[%s179_s5 + $0x4] sm:$0x3]  ;;  %v411_v5 = vld [vmem:[%s179_s5 + $0x6] sm:$0x3] }
  0x54   : > { %v412_v7 = vld [vmem:[%s179_s5 + $0x8] sm:$0x3]  ;;  %v220_v23 = vld [vmem:[%s764_s27] sm:$0x3]  ;;  %vm278_vm5 = vcmask 1041408   ;;  %vm292_vm6 = vcmask 1040384  }
  0x55   : > { %v227_v6 = vmax.f32 %v224_v3, %v410_v4  ;;  %vm237_vm0 = vcmp.eq.s32.totalorder %v220_v23, 0  ;;  %vm244_vm1 = vcmp.eq.s32.totalorder %v220_v23, 1  ;;  %vm251_vm2 = vcmp.eq.s32.totalorder %v220_v23, 2  ;;  %p212_p7 = scmp.lt.s32.totalorder %s603_s12, 1 }
  0x56   : > { %vm258_vm3 = vcmp.eq.s32.totalorder %v220_v23, 3  ;;  %vm265_vm4 = vcmp.eq.s32.totalorder %v220_v23, 4  ;;  %v239_v37 = vsel %vm237_vm0, 0.5, %v617_v0  ;;  %vm305_vm7 = vcmask 0  }
  0x57   : > { %v230_v8 = vmax.f32 %v227_v6, %v411_v5  ;;  %v246_v40 = vsel %vm244_vm1, 1.0, %v239_v37  ;;  %s811_s12 = smov (!%p212_p7, %s603_s12), 1 }
  0x58   : > { %v253_v41 = vsel %vm251_vm2, 1.5, %v246_v40  ;;  %s214_s7 = scalar_lea.vmem %s796_s2, %s811_s12 }
  0x59   : > { %v233_v9 = vmax.f32 %v230_v8, %v412_v7  ;;  %v260_v42 = vsel %vm258_vm3, 2.0, %v253_v41 }
  0x5a   : > { %v267_v43 = vsel %vm265_vm4, 0.75, %v260_v42  ;;  %v277_v55 = vld [vmem:[#allocation2] sm:$0x1] }
  0x5b   : > { %v234_v10 = vsub.f32 %v221_v1, %v233_v9  ;;  %v240_v11 = vsub.f32 %v409_v2, %v233_v9  ;;  %v247_v12 = vsub.f32 %v410_v4, %v233_v9  ;;  %v254_v13 = vsub.f32 %v411_v5, %v233_v9 }
  0x5c   : > { %v261_v14 = vsub.f32 %v412_v7, %v233_v9 }
  0x5d   : > { %v235_v15 = vmul.f32 1.442695, %v234_v10  ;;  %v241_v16 = vmul.f32 1.442695, %v240_v11  ;;  %v248_v17 = vmul.f32 1.442695, %v247_v12 }
  0x5e   : > { %v255_v18 = vmul.f32 1.442695, %v254_v13  ;;  %v262_v19 = vmul.f32 1.442695, %v261_v14  ;;  %v238_v29 = vsel %vm237_vm0, %v234_v10, 0.0 }
  0x5f   : > { %483 = vpow2.f32 %v235_v15  ;;  %v245_v31 = vsel %vm244_vm1, %v240_v11, %v238_v29 }
  0x60   : > { %485 = vpow2.f32 %v241_v16  ;;  %v252_v32 = vsel %vm251_vm2, %v247_v12, %v245_v31 }
  0x61   : > { %487 = vpow2.f32 %v248_v17  ;;  %v259_v33 = vsel %vm258_vm3, %v254_v13, %v252_v32 }
  0x62   : > { %489 = vpow2.f32 %v255_v18  ;;  %v266_v35 = vsel %vm265_vm4, %v261_v14, %v259_v33 }
  0x63   : > { %491 = vpow2.f32 %v262_v19 }
  0x69   : > { %v484_v20 = vpop.eup %483 }
  0x6a   : > { %v486_v21 = vpop.eup %485 }
  0x6b   : > { %v488_v22 = vpop.eup %487  ;;  %v243_v24 = vadd.f32 %v486_v21, %v484_v20 }
  0x6c   : > { %v490_v25 = vpop.eup %489 }
  0x6d   : > { %v250_v26 = vadd.f32 %v488_v22, %v243_v24  ;;  %v492_v27 = vpop.eup %491 }
  0x6f   : > { %v257_v28 = vadd.f32 %v490_v25, %v250_v26 }
  0x71   : > { %v264_v30 = vadd.f32 %v492_v27, %v257_v28 }
  0x73   : > { %493 = vlog2.f32 %v264_v30 }
  0x7d   : > { %v494_v34 = vpop.eup %493 }
  0x7e   : > { %v269_v36 = vmul.f32 0.6931472, %v494_v34 }
  0x80   : > { %v270_v38 = vsub.f32 %v266_v35, %v269_v36 }
  0x82   : > { %v271_v39 = vmul.f32 1.442695, %v270_v38  ;;  %v275_v46 = vmul.f32 %v270_v38, %v267_v43 }
  0x84   : > { %495 = vpow2.f32 %v271_v39 }
  0x8e   : > { %v496_v44 = vpop.eup %495 }
  0x8f   : > { %v273_v45 = vsub.f32 1.0, %v496_v44 }
  0x91   : > { %v274_v47 = vmul.f32 %v273_v45, %v273_v45 }
  0x93   : > { %v276_v48 = vmul.f32 %v275_v46, %v274_v47 }
  0x95   : > { %v279_v49 = vsel %vm278_vm5, %v276_v48, 0.0 }
  0x96   : > { %v280_v50 = vrot.slane %v279_v49, 4 }
  0x98   : > { %v281_v51 = vadd.f32 %v280_v50, %v279_v49 }
  0x9a   : > { %v282_v52 = vrot.slane %v281_v51, 2 }
  0x9c   : > { %v283_v53 = vadd.f32 %v282_v52, %v281_v51 }
  0x9e   : > { %v284_v54 = vrot.slane %v283_v53, 1 }
  0xa0   : > { %v285_v56 = vadd.f32 %v284_v54, %v283_v53 }
  0xa2   : > { %v286_v57 = vadd.f32 %v285_v56, %v277_v55 }
  0xa4   : > { %287 = vst [vmem:[#allocation2] sm:$0x1] %v286_v57 }
  0xab   : > { %v291_v58 = vld [vmem:[#allocation2] sm:$0x1] }
  0xac   : > { %v293_v59 = vsel %vm292_vm6, %v291_v58, 0.0 }
  0xad   : > { %294 = vadd.xlane.f32.xlu0 %v293_v59 }
 0x13a   : > { %v295_v60 = vpop.xlane.xlu0 %294 }
 0x13b   : > { %v296_v61 = vrot.slane %v295_v60, 4 }
 0x13d   : > { %v297_v62 = vadd.f32 %v296_v61, %v295_v60 }
 0x13f   : > { %v298_v63 = vrot.slane %v297_v62, 2 }
 0x141   : > { %v299_v0 = vadd.f32 %v298_v63, %v297_v62 }
 0x143   : > { %v300_v1 = vrot.slane %v299_v0, 1 }
 0x145   : > { %v301_v2 = vadd.f32 %v300_v1, %v299_v0 }
 0x147   : > { %418 = vpush %v301_v2 }
 0x178   : > { %s419_s19 = spop %418 }
 0x179   : > { %s303_s26 = ssub.f32 0.0, %s419_s19 }
 0x17b   : > { %v304_v3 = vstv %s303_s26 }
 0x17c   : > { %306 = vst.msk [vmem:[%s214_s7] sm:$0x1] %vm305_vm7, %v304_v3 }
 0x17d PF: > { %s18_s14 = sadd.s32 1, %s611_s14   ;;  %s803_s9 = smov %s595_s10 }
 0x17e   : > { %p15_p9 = scmp.ge.s32.totalorder %s18_s14, 4   ;;  %s804_s10 = smov %s599_s11 }
 0x17f   : > { %s805_s11 = smov %s678_s20  ;;  %s806_s12 = smov %s607_s13 }
 0x180   : > { %s807_s13 = smov %s809_s16  ;;  %17 = sbr.rel (!%p15_p9) target bundleno = 6 (0x6), region = 93 }
 0x187   :  { %324 = vsyncpa [#allocation4], 1 }
 0x188   :  { %326 = vsyncpa [#allocation4 + $0x1], 1 }
 0x189   :  { %327 = vsyncpa [#allocation6], 1 }
 0x18a   :  { %329 = vsyncpa [#allocation6 + $0x1], 1 }

</bundles_post_ra>
